<compile_context>
chip_gen: v7x
topology: tpu7x:2x2x1
jax: 0.10.0
libtpu: 0.0.40
codegen_flags: <defaults>
</compile_context>

<pallas_src>
import functools

import jax
import jax.numpy as jnp
from jax.experimental import pallas as pl
from jax.experimental.pallas import tpu as pltpu


DEFAULT_HIDDEN = [64, 64]
BN_EPS = 1e-5
TILE_B_MAX = 4096    # batch tile upper bound (rows, f32, multiple of 8)


def _round_up(n, m):
    return ((n + m - 1) // m) * m


def _cdiv(a, b):
    return -(-a // b)


# ---------------------------------------------------------------------------
# Forward kernel: Linear+ReLU x2 and a single fused (mu | value) head matmul.
# BN is already folded into (w1, b1) by the wrapper.  Output slab lanes:
#   [0, A) -> tanh(mu),  lane A -> value,  remaining lanes -> padding.
# ---------------------------------------------------------------------------
def forward_kernel(x_ref, w1_ref, b1_ref, w2_ref, b2_ref, wh_ref, bh_ref,
                   out_ref, *, action_size):
    x = x_ref[...].astype(jnp.float32)

    h1 = jnp.dot(x, w1_ref[...], preferred_element_type=jnp.float32) + b1_ref[...]
    h1 = jnp.maximum(h1, 0.0)
    h2 = jnp.dot(h1, w2_ref[...], preferred_element_type=jnp.float32) + b2_ref[...]
    h2 = jnp.maximum(h2, 0.0)

    heads = jnp.dot(h2, wh_ref[...], preferred_element_type=jnp.float32) + bh_ref[...]
    lane = jax.lax.broadcasted_iota(jnp.int32, heads.shape, 1)
    # tanh only on the mu lanes; the value lane passes through.
    out_ref[...] = jnp.where(lane < action_size, jnp.tanh(heads), heads).astype(
        out_ref.dtype)


# ---------------------------------------------------------------------------
# Parameter init (mirrors the PyTorch module's shapes / default inits).
# Linear weights are stored pre-transposed as (in_features, out_features).
# ---------------------------------------------------------------------------
def init_params(key, state_size, action_size, layer_nodes=None):
    if layer_nodes is None:
        layer_nodes = DEFAULT_HIDDEN
    ks = jax.random.split(key, 8)

    def linear(kw, kb, fan_in, fan_out):
        bound = 1.0 / jnp.sqrt(jnp.float32(fan_in))
        w = jax.random.uniform(kw, (fan_in, fan_out), jnp.float32, -bound, bound)
        b = jax.random.uniform(kb, (1, fan_out), jnp.float32, -bound, bound)
        return w, b

    p = {}
    p["bn_w"] = jnp.ones((1, state_size), jnp.float32)    # BatchNorm1d weight
    p["bn_b"] = jnp.zeros((1, state_size), jnp.float32)   # BatchNorm1d bias
    p["w1"], p["b1"] = linear(ks[0], ks[1], state_size, layer_nodes[0])
    p["w2"], p["b2"] = linear(ks[2], ks[3], layer_nodes[0], layer_nodes[1])
    p["wmu"], p["bmu"] = linear(ks[4], ks[5], layer_nodes[1], action_size)
    p["sigma"] = jnp.ones((1, action_size), jnp.float32)  # nn.Parameter(torch.ones)
    p["wv"], p["bv"] = linear(ks[6], ks[7], layer_nodes[1], 1)
    return p


# ---------------------------------------------------------------------------
# Forward wrapper
# ---------------------------------------------------------------------------
@jax.jit
def actor_critic_forward(x, params):
    """Returns (mu, sigma, value); Normal(mu, sigma) is just (loc, scale)."""
    B, S = x.shape
    H2 = params["w2"].shape[1]
    A = params["wmu"].shape[1]
    OUT_W = _round_up(A + 1, 8)   # narrow output slab: mu lanes + value lane

    x = x.astype(jnp.float32)

    # --- training-mode BN statistics (two-pass form, numerically stable);
    #     XLA fuses this tiny reduction with the w1/b1 fold below ---
    mean = jnp.mean(x, axis=0, keepdims=True)                 # (1, S)
    var = jnp.mean(jnp.square(x - mean), axis=0, keepdims=True)  # biased var

    # --- fold BatchNorm into layer 1 ---
    scale = params["bn_w"] * jax.lax.rsqrt(var + BN_EPS)       # (1, S)
    shift = params["bn_b"] - mean * scale                      # (1, S)
    w1_eff = params["w1"] * scale.T                            # (S, H1)
    b1_eff = params["b1"] + shift @ params["w1"]               # (1, H1)

    # --- fuse mu / value heads into one narrow matmul ---
    wh = jnp.zeros((H2, OUT_W), jnp.float32)
    wh = wh.at[:, :A].set(params["wmu"]).at[:, A:A + 1].set(params["wv"])
    bh = jnp.zeros((1, OUT_W), jnp.float32)
    bh = bh.at[:, :A].set(params["bmu"]).at[:, A:A + 1].set(params["bv"])

    # --- batch tiling: pad to a multiple of 8 only, bound padding waste,
    #     and guarantee >= 2 tiles (v7x megacore) when B_pad >= 16 ---
    B_pad8 = _round_up(B, 8)
    num_tiles = max(1, _cdiv(B_pad8, TILE_B_MAX))
    if B_pad8 >= 16:
        num_tiles = max(num_tiles, 2)
    tile_b = _round_up(_cdiv(B_pad8, num_tiles), 8)
    B_pad = tile_b * num_tiles
    x_p = x if B_pad == B else jnp.pad(x, ((0, B_pad - B), (0, 0)))

    kernel = functools.partial(forward_kernel, action_size=A)
    resident = lambda arr: pl.BlockSpec(arr.shape, lambda i: (0,) * arr.ndim)

    out = pl.pallas_call(
        kernel,
        out_shape=jax.ShapeDtypeStruct((B_pad, OUT_W), jnp.float32),
        grid=(num_tiles,),
        in_specs=[
            pl.BlockSpec((tile_b, S), lambda i: (i, 0)),   # x: pipelined over B
            resident(w1_eff), resident(b1_eff),            # weights: VMEM-resident
            resident(params["w2"]), resident(params["b2"]),
            resident(wh), resident(bh),
        ],
        out_specs=pl.BlockSpec((tile_b, OUT_W), lambda i: (i, 0)),
        compiler_params=pltpu.CompilerParams(
            dimension_semantics=("parallel",),
            vmem_limit_bytes=32 * 1024 * 1024),
    )(x_p, w1_eff, b1_eff, params["w2"], params["b2"], wh, bh)

    mu = out[:B, :A]
    value = out[:B, A:A + 1]
    # sigma is batch-independent: computed once per call, outside the kernel.
    sigma = jax.nn.softplus(params["sigma"])
    return mu, sigma, value


# ---------------------------------------------------------------------------
# Pure-JAX reference (matches the PyTorch forward in training mode)
# ---------------------------------------------------------------------------
def reference_forward(x, params):
    mean = jnp.mean(x, axis=0, keepdims=True)
    var = jnp.mean((x - mean) ** 2, axis=0, keepdims=True)
    xn = (x - mean) * jax.lax.rsqrt(var + BN_EPS) * params["bn_w"] + params["bn_b"]
    h1 = jnp.maximum(xn @ params["w1"] + params["b1"], 0.0)
    h2 = jnp.maximum(h1 @ params["w2"] + params["b2"], 0.0)
    mu = jnp.tanh(h2 @ params["wmu"] + params["bmu"])
    sigma = jax.nn.softplus(params["sigma"])
    value = h2 @ params["wv"] + params["bv"]
    return mu, sigma, value


if __name__ == "__main__":
    key = jax.random.PRNGKey(0)
    k_x, k_p = jax.random.split(key)

    batch = 8
    state_size = 16
    action_size = 4

    x = jax.random.normal(k_x, (batch, state_size), jnp.float32)
    params = init_params(k_p, state_size, action_size)

    mu, sigma, value = actor_critic_forward(x, params)
    jax.block_until_ready((mu, sigma, value))

    assert mu.shape == (batch, action_size)
    assert sigma.shape == (1, action_size)
    assert value.shape == (batch, 1)
    assert bool(jnp.all(jnp.isfinite(mu)))
    assert bool(jnp.all(sigma > 0))
    assert bool(jnp.all(jnp.isfinite(value)))

    mu_r, sigma_r, value_r = reference_forward(x, params)
    assert bool(jnp.allclose(mu, mu_r, atol=1e-4, rtol=1e-4))
    assert bool(jnp.allclose(sigma, sigma_r, atol=1e-5, rtol=1e-5))
    assert bool(jnp.allclose(value, value_r, atol=1e-4, rtol=1e-4))

    # A second, larger/odd batch to exercise multi-tile + padding path.
    x2 = jax.random.normal(k_x, (37, state_size), jnp.float32)
    mu2, sigma2, value2 = actor_critic_forward(x2, params)
    jax.block_until_ready((mu2, sigma2, value2))
    mu2_r, _, value2_r = reference_forward(x2, params)
    assert bool(jnp.allclose(mu2, mu2_r, atol=1e-4, rtol=1e-4))
    assert bool(jnp.allclose(value2, value2_r, atol=1e-4, rtol=1e-4))

    print("KERNEL_OK")
</pallas_src>

<mosaic_0001>
module attributes {stable_mosaic.version = 11 : i64} {
  func.func @forward_kernel(%arg0: i32, %arg1: memref<8x16xf32, #tpu.memory_space<vmem>>, %arg2: memref<16x64xf32, #tpu.memory_space<vmem>>, %arg3: memref<1x64xf32, #tpu.memory_space<vmem>>, %arg4: memref<64x64xf32, #tpu.memory_space<vmem>>, %arg5: memref<1x64xf32, #tpu.memory_space<vmem>>, %arg6: memref<64x8xf32, #tpu.memory_space<vmem>>, %arg7: memref<1x8xf32, #tpu.memory_space<vmem>>, %arg8: memref<8x8xf32, #tpu.memory_space<vmem>>) attributes {dimension_semantics = [#tpu.dimension_semantics<parallel>], iteration_bounds = array<i64: 1>, scalar_prefetch = 0 : i64, scratch_operands = 0 : i64, tpu.core_type = #tpu.core_type<tc>, window_params = [{transform_indices = @transform_0, window_bounds = array<i64: 8, 16>}, {pipeline_mode = #tpu.pipeline_mode<synchronous>, transform_indices = @transform_1, window_bounds = array<i64: 16, 64>}, {pipeline_mode = #tpu.pipeline_mode<synchronous>, transform_indices = @transform_2, window_bounds = array<i64: 1, 64>}, {pipeline_mode = #tpu.pipeline_mode<synchronous>, transform_indices = @transform_3, window_bounds = array<i64: 64, 64>}, {pipeline_mode = #tpu.pipeline_mode<synchronous>, transform_indices = @transform_4, window_bounds = array<i64: 1, 64>}, {pipeline_mode = #tpu.pipeline_mode<synchronous>, transform_indices = @transform_5, window_bounds = array<i64: 64, 8>}, {pipeline_mode = #tpu.pipeline_mode<synchronous>, transform_indices = @transform_6, window_bounds = array<i64: 1, 8>}, {transform_indices = @transform_7, window_bounds = array<i64: 8, 8>}]} {
    %c0 = arith.constant 0 : index
    %c0_0 = arith.constant 0 : index
    %0 = vector.load %arg1[%c0, %c0_0] : memref<8x16xf32, #tpu.memory_space<vmem>>, vector<8x16xf32>
    %c0_1 = arith.constant 0 : index
    %c0_2 = arith.constant 0 : index
    %1 = vector.load %arg2[%c0_1, %c0_2] : memref<16x64xf32, #tpu.memory_space<vmem>>, vector<16x64xf32>
    %cst = arith.constant dense<0.000000e+00> : vector<8x64xf32>
    %2 = tpu.matmul %0, %1, %cst {dimension_numbers = #tpu.dot_dimension_numbers<[1], [0], [0], [1], [0, 0, 1, 1], [], []>} : vector<8x16xf32>, vector<16x64xf32>, vector<8x64xf32> -> vector<8x64xf32>
    %c0_3 = arith.constant 0 : index
    %c0_4 = arith.constant 0 : index
    %3 = vector.load %arg3[%c0_3, %c0_4] : memref<1x64xf32, #tpu.memory_space<vmem>>, vector<1x64xf32>
    %4 = vector.broadcast %3 : vector<1x64xf32> to vector<8x64xf32>
    %5 = arith.addf %2, %4 : vector<8x64xf32>
    %cst_5 = arith.constant 0.000000e+00 : f32
    %6 = vector.broadcast %cst_5 : f32 to vector<8x64xf32>
    %7 = arith.maximumf %5, %6 : vector<8x64xf32>
    %c0_6 = arith.constant 0 : index
    %c0_7 = arith.constant 0 : index
    %8 = vector.load %arg4[%c0_6, %c0_7] : memref<64x64xf32, #tpu.memory_space<vmem>>, vector<64x64xf32>
    %cst_8 = arith.constant dense<0.000000e+00> : vector<8x64xf32>
    %9 = tpu.matmul %7, %8, %cst_8 {dimension_numbers = #tpu.dot_dimension_numbers<[1], [0], [0], [1], [0, 0, 1, 1], [], []>} : vector<8x64xf32>, vector<64x64xf32>, vector<8x64xf32> -> vector<8x64xf32>
    %c0_9 = arith.constant 0 : index
    %c0_10 = arith.constant 0 : index
    %10 = vector.load %arg5[%c0_9, %c0_10] : memref<1x64xf32, #tpu.memory_space<vmem>>, vector<1x64xf32>
    %11 = vector.broadcast %10 : vector<1x64xf32> to vector<8x64xf32>
    %12 = arith.addf %9, %11 : vector<8x64xf32>
    %cst_11 = arith.constant 0.000000e+00 : f32
    %13 = vector.broadcast %cst_11 : f32 to vector<8x64xf32>
    %14 = arith.maximumf %12, %13 : vector<8x64xf32>
    %c0_12 = arith.constant 0 : index
    %c0_13 = arith.constant 0 : index
    %15 = vector.load %arg6[%c0_12, %c0_13] : memref<64x8xf32, #tpu.memory_space<vmem>>, vector<64x8xf32>
    %cst_14 = arith.constant dense<0.000000e+00> : vector<8x8xf32>
    %16 = tpu.matmul %14, %15, %cst_14 {dimension_numbers = #tpu.dot_dimension_numbers<[1], [0], [0], [1], [0, 0, 1, 1], [], []>} : vector<8x64xf32>, vector<64x8xf32>, vector<8x8xf32> -> vector<8x8xf32>
    %c0_15 = arith.constant 0 : index
    %c0_16 = arith.constant 0 : index
    %17 = vector.load %arg7[%c0_15, %c0_16] : memref<1x8xf32, #tpu.memory_space<vmem>>, vector<1x8xf32>
    %18 = vector.broadcast %17 : vector<1x8xf32> to vector<8x8xf32>
    %19 = arith.addf %16, %18 : vector<8x8xf32>
    %20 = tpu.iota {dimensions = array<i32: 1>} : vector<8x8xi32>
    %c4_i32 = arith.constant 4 : i32
    %21 = vector.broadcast %c4_i32 : i32 to vector<8x8xi32>
    %22 = arith.cmpi slt, %20, %21 : vector<8x8xi32>
    %23 = math.tanh %19 : vector<8x8xf32>
    %24 = arith.select %22, %23, %19 : vector<8x8xi1>, vector<8x8xf32>
    %c0_17 = arith.constant 0 : index
    %c0_18 = arith.constant 0 : index
    %25 = vector.load %arg8[%c0_17, %c0_18] : memref<8x8xf32, #tpu.memory_space<vmem>>, vector<8x8xf32>
    tpu.vector_store %arg8[%c0_17, %c0_18], %24 {strides = array<i32>} : memref<8x8xf32, #tpu.memory_space<vmem>>, vector<8x8xf32>,
    return
  }
  func.func @transform_0(%arg0: i32) -> (i32, i32) {
    %c0_i32 = arith.constant 0 : i32
    %c0_i32_0 = arith.constant 0 : i32
    return %arg0, %c0_i32 : i32, i32
  }
  func.func @transform_1(%arg0: i32) -> (i32, i32) {
    %c0_i32 = arith.constant 0 : i32
    %c0_i32_0 = arith.constant 0 : i32
    %c0_i32_1 = arith.constant 0 : i32
    return %c0_i32, %c0_i32_0 : i32, i32
  }
  func.func @transform_2(%arg0: i32) -> (i32, i32) {
    %c0_i32 = arith.constant 0 : i32
    %c0_i32_0 = arith.constant 0 : i32
    %c0_i32_1 = arith.constant 0 : i32
    return %c0_i32, %c0_i32_0 : i32, i32
  }
  func.func @transform_3(%arg0: i32) -> (i32, i32) {
    %c0_i32 = arith.constant 0 : i32
    %c0_i32_0 = arith.constant 0 : i32
    %c0_i32_1 = arith.constant 0 : i32
    return %c0_i32, %c0_i32_0 : i32, i32
  }
  func.func @transform_4(%arg0: i32) -> (i32, i32) {
    %c0_i32 = arith.constant 0 : i32
    %c0_i32_0 = arith.constant 0 : i32
    %c0_i32_1 = arith.constant 0 : i32
    return %c0_i32, %c0_i32_0 : i32, i32
  }
  func.func @transform_5(%arg0: i32) -> (i32, i32) {
    %c0_i32 = arith.constant 0 : i32
    %c0_i32_0 = arith.constant 0 : i32
    %c0_i32_1 = arith.constant 0 : i32
    return %c0_i32, %c0_i32_0 : i32, i32
  }
  func.func @transform_6(%arg0: i32) -> (i32, i32) {
    %c0_i32 = arith.constant 0 : i32
    %c0_i32_0 = arith.constant 0 : i32
    %c0_i32_1 = arith.constant 0 : i32
    return %c0_i32, %c0_i32_0 : i32, i32
  }
  func.func @transform_7(%arg0: i32) -> (i32, i32) {
    %c0_i32 = arith.constant 0 : i32
    %c0_i32_0 = arith.constant 0 : i32
    return %arg0, %c0_i32 : i32, i32
  }
}

</mosaic_0001>

<bundles_post_ra>
// kernel: actor_critic_forward.1
= control target key start
LH: loop header
LB: loop body
LE: loop exit
PB: predicated region body
PF: predicated region fallthrough
CT: control target
= control target key end

     0   :  { %v404_v0 = vmov 0.0|0.0   ;;  %vm405_vm0 = vmmov 0   ;;  %v406_v3 = vmov 0.0   ;;  %vm36_vm1 = vcmask 130048   ;;  %s519_s1 = inlined_call_operand.vmem [shape: f32[16,64], index: 1, kind: input, shape index: {}]   ;;  %s520_s3 = inlined_call_operand.vmem [shape: f32[64,64], index: 3, kind: input, shape index: {}]   ;;  %s521_s0 = inlined_call_operand.vmem [shape: f32[8,16], index: 0, kind: input, shape index: {}]   ;;  %s522_s5 = inlined_call_operand.vmem [shape: f32[64,8], index: 5, kind: input, shape index: {}]   ;;  %s523_s2 = inlined_call_operand.vmem [shape: f32[1,64], index: 2, kind: input, shape index: {}]   ;;  %s524_s4 = inlined_call_operand.vmem [shape: f32[1,64], index: 4, kind: input, shape index: {}]   ;;  %s525_s6 = inlined_call_operand.vmem [shape: f32[1,8], index: 6, kind: input, shape index: {}]   ;;  %s526_s7 = inlined_call_operand.vmem [shape: f32[8,8], index: 7, kind: output, shape index: {}]  }
   0x1   :  { %372 = vmatprep.subr.bf16.mxu0 %v404_v0  ;;  %v27_v1 = vld [vmem:[%s519_s1] sm:$0xff]  ;;  %v28_v2 = vld [vmem:[%s519_s1 + $0x8] sm:$0xff]  ;;  %331 = vmatprep.mubr.msk.f32.mxu0 %vm405_vm0, %v406_v3  ;;  %v113_v7 = vld [vmem:[%s520_s3 + $0x10] sm:$0xff]  ;;  %vm126_vm2 = vcmask 523264   ;;  %v289_v44 = vlaneseq  ;;  %vm294_vm4 = vcmask 64512  }
   0x2   :  { %v373_v4 = vpack.c.bf16 %v28_v2, %v27_v1  ;;  %375 = vmatprep.subr.bf16.mxu1 %v404_v0  ;;  %v111_v5 = vld [vmem:[%s520_s3] sm:$0xff]  ;;  %v112_v6 = vld [vmem:[%s520_s3 + $0x8] sm:$0xff]  ;;  %350 = vmatprep.mubr.msk.f32.mxu1 %vm405_vm0, %v406_v3  ;;  %v114_v9 = vld [vmem:[%s520_s3 + $0x18] sm:$0xff] }
   0x3   :  { %v376_v8 = vpack.c.bf16 %v112_v6, %v111_v5  ;;  %v26_v10 = vld [vmem:[%s521_s0] sm:$0xff]  ;;  %v379_v11 = vpack.c.bf16 %v114_v9, %v113_v7  ;;  %v116_v13 = vld [vmem:[%s520_s3 + $0x28] sm:$0xff]  ;;  %v117_v15 = vld [vmem:[%s520_s3 + $0x30] sm:$0xff]  ;;  %v290_v45 = vand.u32 127, %v289_v44 }
   0x4   :  { %374 = vmatpush3.bf16.msra.mxu0 %v373_v4  ;;  %v115_v12 = vld [vmem:[%s520_s3 + $0x20] sm:$0xff]  ;;  %v118_v16 = vld [vmem:[%s520_s3 + $0x38] sm:$0xff]  ;;  %v202_v19 = vld [vmem:[%s522_s5 + $0x8] sm:$0xff] }
   0x5   :  { %377 = vmatpush3.bf16.msra.mxu1 %v376_v8  ;;  %387 = vmatprep.subr.bf16.mxu0 %v404_v0  ;;  %v382_v14 = vpack.c.bf16 %v116_v13, %v115_v12  ;;  %v385_v17 = vpack.c.bf16 %v118_v16, %v117_v15  ;;  %v201_v18 = vld [vmem:[%s522_s5] sm:$0xff]  ;;  %v203_v20 = vld [vmem:[%s522_s5 + $0x10] sm:$0xff]  ;;  %v204_v22 = vld [vmem:[%s522_s5 + $0x18] sm:$0xff]  ;;  %vm291_vm3 = vcmp.lt.s32.totalorder %v290_v45, 4 }
   0x6   :  { %378 = vmatprep.subr.bf16.mxu1 %v404_v0  ;;  %v388_v21 = vpack.c.bf16 %v202_v19, %v201_v18  ;;  %v391_v23 = vpack.c.bf16 %v204_v22, %v203_v20  ;;  %v205_v24 = vld [vmem:[%s522_s5 + $0x20] sm:$0xff]  ;;  %v206_v25 = vld [vmem:[%s522_s5 + $0x28] sm:$0xff]  ;;  %v207_v32 = vld [vmem:[%s522_s5 + $0x30] sm:$0xff] }
   0x7   :  { %332 = vmatmul.mubr.msk.f32.vlgmr.msra.gmra.mrb[0].mxu0 %vm36_vm1, %v26_v10  ;;  %v394_v26 = vpack.c.bf16 %v206_v25, %v205_v24  ;;  %v300_v27 = vld [vmem:[%s523_s2] ss:$0 sm:$0xff]  ;;  %v208_v33 = vld [vmem:[%s522_s5 + $0x38] sm:$0xff] }
   0x8   :  { %369 = vmatprep.mubr.msk.f32.mxu0 %vm405_vm0, %v406_v3  ;;  %389 = vmatpush3.bf16.msra.mxu0 %v388_v21  ;;  %v397_v34 = vpack.c.bf16 %v208_v33, %v207_v32  ;;  %v302_v35 = vld [vmem:[%s524_s4] ss:$0 sm:$0xff] }
   0x9   :  { %380 = vmatpush3.bf16.msra.mxu1 %v379_v11  ;;  %390 = vmatprep.subr.bf16.mxu0 %v404_v0  ;;  %v304_v40 = vld [vmem:[%s525_s6] ss:$0 sm:$0xff] }
   0xa   :  { %381 = vmatprep.subr.bf16.mxu1 %v404_v0 }
   0xc   :  { %392 = vmatpush3.bf16.msra.mxu0 %v391_v23 }
   0xd   :  { %383 = vmatpush3.bf16.msra.mxu1 %v382_v14  ;;  %393 = vmatprep.subr.bf16.mxu0 %v404_v0 }
   0xe   :  { %384 = vmatprep.subr.bf16.mxu1 %v404_v0 }
  0x10   :  { %395 = vmatpush3.bf16.msra.mxu0 %v394_v26 }
  0x11   :  { %386 = vmatpush3.bf16.msra.mxu1 %v385_v17  ;;  %396 = vmatprep.subr.bf16.mxu0 %v404_v0 }
  0x14   :  { %398 = vmatpush3.bf16.msra.mxu0 %v397_v34 }
  0xda   :  { %v106_v28 = vpop.f32.mrb[0].mxu0 }
  0xdb   :  { %v107_v29 = vadd.f32 %v300_v27, %v106_v28  ;;  %v333_v30 = vpop.f32.mrb[1].mxu0 }
  0xdd   :  { %v110_v31 = vmax.f32 %v107_v29, 0.0 }
  0xdf   :  { %351 = vmatmul.mubr.msk.f32.vlgmr.msra.gmra.mrb[0].mxu1 %vm126_vm2, %v110_v31 }
 0x1b2   :  { %v196_v36 = vpop.f32.mrb[0].mxu1 }
 0x1b3   :  { %v197_v37 = vadd.f32 %v302_v35, %v196_v36  ;;  %v352_v38 = vpop.f32.mrb[1].mxu1 }
 0x1b5   :  { %v200_v39 = vmax.f32 %v197_v37, 0.0 }
 0x1b7   :  { %370 = vmatmul.mubr.msk.f32.vlgmr.msra.gmra.mrb[2].mxu0 %vm126_vm2, %v200_v39 }
 0x28a   :  { %v285_v41 = vpop.f32.mrb[2].mxu0 }
 0x28b   :  { %v286_v42 = vadd.f32 %v304_v40, %v285_v41  ;;  %v371_v43 = vpop.f32.mrb[3].mxu0 }
 0x28d   :  { %402 = vtanh.f32 %v286_v42 }
 0x297   :  { %v403_v46 = vpop.eup %402 }
 0x298   :  { %v293_v47 = vsel %vm291_vm3, %v403_v46, %v286_v42 }
 0x299   :  { %295 = vst.msk [vmem:[%s526_s7] sm:$0xff] %vm294_vm4, %v293_v47 }

</bundles_post_ra>
